<compile_context>
chip_gen: v7x
topology: tpu7x:2x2x1
jax: 0.10.0
libtpu: 0.0.40
codegen_flags: <defaults>
</compile_context>

<pallas_src>
import jax
import jax.numpy as jnp
from jax.experimental import pallas as pl
from jax.experimental.pallas import tpu as pltpu


# ----------------------------- Pallas kernel ------------------------------- #

def _copy_kernel(x_ref, o_ref):
    """Identity copy of one sublane-full, lane-dense (tr, C) tile."""
    o_ref[...] = x_ref[...]


# ------------------------------ tiling plan -------------------------------- #

_LANE = 128
_BUDGET_BYTES = 4 * 1024 * 1024          # per tile, per side (in or out)
_VMEM_LIMIT_BYTES = 48 * 1024 * 1024     # raised scoped VMEM (<= v7x 64 MiB)


def _sublane_pack(dtype):
    itemsize = jnp.dtype(dtype).itemsize
    return max(8, 32 // itemsize)        # 8 f32, 16 bf16, 32 int8


def _choose_slab_and_tiles(total, dtype):
    """Pick a (R, C) slab view of the contiguous data plus a (tr, C) row tile.

    Constraints:
      * C is a multiple of 128 (lane-dense, unmasked vst),
      * tr is a multiple of the sublane pack (full vregs),
      * tr * C * itemsize <= _BUDGET_BYTES,
      * >= 2 grid steps; an even step count is preferred (v7x 2-TC sharding),
      * larger C preferred (amortizes per-step overhead).

    Returns (R, C, tr, steps) or None if no such tiling exists.
    """
    itemsize = jnp.dtype(dtype).itemsize
    pack = _sublane_pack(dtype)
    if total <= 0 or total % (pack * _LANE) != 0:
        return None

    best_score, best_plan = None, None
    for c in (4096, 2048, 1024, 512, 256, 128):
        if total % c:
            continue
        r = total // c
        if r % pack:
            continue
        max_tr_budget = (_BUDGET_BYTES // (c * itemsize)) // pack * pack
        if max_tr_budget < pack:
            continue
        tr, t = None, pack
        limit = min(r // 2, max_tr_budget)          # >= 2 grid steps
        while t <= limit:
            if r % t == 0:
                tr = t
            t += pack
        if tr is None:
            continue
        steps = r // tr
        score = (steps % 2 == 0, c)                 # even grid first, then wide C
        if best_score is None or score > best_score:
            best_score, best_plan = score, (r, c, tr, steps)
    return best_plan


# -------------------------------- wrappers ---------------------------------- #

def flatten(x):
    """Recommended path: torch `x.view(x.shape[0], -1)` is metadata-only."""
    return x.reshape(x.shape[0], -1)


def pallas_flatten(x, *, donate=False):
    """Materializing Pallas copy that produces the flattened (N, K) output.

    The copy is laid out over a sublane-full / lane-dense (R, C) slab view of
    the contiguous bytes (decoupled from N and K), then re-viewed as (N, K)
    with a final metadata-only reshape.
    """
    n = x.shape[0]
    k = 1
    for d in x.shape[1:]:
        k *= d
    total = n * k

    plan = _choose_slab_and_tiles(total, x.dtype)
    if plan is None:
        # No aligned slab tiling (tiny / odd-sized input): the view is
        # metadata-only, so just return it — never ship the whole array as a
        # single double-buffered block.
        return x.reshape(n, k)

    r, c, tr, steps = plan
    slab = x.reshape(r, c)  # metadata-only: contiguous row-major bytes

    out_slab = pl.pallas_call(
        _copy_kernel,
        out_shape=jax.ShapeDtypeStruct((r, c), x.dtype),
        grid=(steps,),
        in_specs=[pl.BlockSpec((tr, c), lambda i: (i, 0))],
        out_specs=pl.BlockSpec((tr, c), lambda i: (i, 0)),
        input_output_aliases=({0: 0} if donate else {}),
        compiler_params=pltpu.CompilerParams(
            dimension_semantics=("parallel",),
            vmem_limit_bytes=_VMEM_LIMIT_BYTES,
        ),
    )(slab)

    return out_slab.reshape(n, k)  # metadata-only


# --------------------------------- main ------------------------------------- #

if __name__ == "__main__":
    key = jax.random.PRNGKey(0)

    # Shapes consistent with the module: batch=2, channels=4, 16x16 spatial.
    x = jax.random.normal(key, (2, 4, 16, 16), jnp.float32)

    out = jax.jit(pallas_flatten)(x)
    out = jax.block_until_ready(out)

    # Reference: torch `x.view(x.shape[0], -1)` == row-major reshape.
    ref = x.reshape(x.shape[0], -1)
    assert out.shape == (2, 4 * 16 * 16), out.shape
    assert out.dtype == x.dtype, out.dtype
    assert jnp.array_equal(out, ref), float(jnp.max(jnp.abs(out - ref)))

    print("KERNEL_OK")
</pallas_src>

<mosaic_0001>
module attributes {stable_mosaic.version = 11 : i64} {
  func.func @_copy_kernel(%arg0: i32, %arg1: memref<8x128xf32, #tpu.memory_space<vmem>>, %arg2: memref<8x128xf32, #tpu.memory_space<vmem>>) attributes {dimension_semantics = [#tpu.dimension_semantics<parallel>], iteration_bounds = array<i64: 2>, scalar_prefetch = 0 : i64, scratch_operands = 0 : i64, tpu.core_type = #tpu.core_type<tc>, window_params = [{transform_indices = @transform_0, window_bounds = array<i64: 8, 128>}, {transform_indices = @transform_1, window_bounds = array<i64: 8, 128>}]} {
    %c0 = arith.constant 0 : index
    %c0_0 = arith.constant 0 : index
    %0 = vector.load %arg1[%c0, %c0_0] : memref<8x128xf32, #tpu.memory_space<vmem>>, vector<8x128xf32>
    %c0_1 = arith.constant 0 : index
    %c0_2 = arith.constant 0 : index
    %1 = vector.load %arg2[%c0_1, %c0_2] : memref<8x128xf32, #tpu.memory_space<vmem>>, vector<8x128xf32>
    tpu.vector_store %arg2[%c0_1, %c0_2], %0 {strides = array<i32>} : memref<8x128xf32, #tpu.memory_space<vmem>>, vector<8x128xf32>,
    return
  }
  func.func @transform_0(%arg0: i32) -> (i32, i32) {
    %c0_i32 = arith.constant 0 : i32
    %c0_i32_0 = arith.constant 0 : i32
    return %arg0, %c0_i32 : i32, i32
  }
  func.func @transform_1(%arg0: i32) -> (i32, i32) {
    %c0_i32 = arith.constant 0 : i32
    %c0_i32_0 = arith.constant 0 : i32
    return %arg0, %c0_i32 : i32, i32
  }
}

</mosaic_0001>

<bundles_post_ra>
// kernel: pallas_flatten.1
= control target key start
LH: loop header
LB: loop body
LE: loop exit
PB: predicated region body
PF: predicated region fallthrough
CT: control target
= control target key end

     0   :  { %s188_s6 = smov 0   ;;  %s208_s0 = inlined_call_operand.vmem [shape: f32[16,128], index: 0, kind: input, shape index: {}]   ;;  %s209_s1 = inlined_call_operand.vmem [shape: f32[16,128], index: 1, kind: output, shape index: {}]  }
   0x1 LB: > { %s167_s7 = sadd.s32 4294967295, %s190_s6   ;;  %p171_p0 = scmp.ge.s32.totalorder %s190_s6, 1  ;;  %s190_s6 = sphi %s188_s6, %s11_s6  }
   0x2   : > { %p86_p1 = scmp.lt.s32.totalorder %s190_s6, 3 }
   0x4   : > { %p87_p2 = pnand %p171_p0, %p86_p1 }
   0x5   : > { %p104_p3 = scmp.lt.s32.totalorder (!%p87_p2), %s167_s7, 1 }
   0x6   : > { %90 = sbr.rel (%p87_p2) target bundleno = 18 (0x12), region = 24 }
   0xd   : > { %s211_s7 = smov (!%p104_p3, %s167_s7), 1 }
   0xe   : > { %s172_s8 = sshll.u32 %s211_s7, 3 }
   0xf   : > { %s107_s11 = scalar_lea.vmem %s208_s0, %s172_s8  ;;  %s111_s14 = scalar_lea.vmem %s209_s1, %s172_s8 }
  0x10   : > { %v112_v0 = vld [vmem:[%s107_s11] sm:$0xff] }
  0x11   : > { %113 = vst [vmem:[%s111_s14] sm:$0xff] %v112_v0 }
  0x12 PF: > { %s11_s6 = sadd.s32 1, %s190_s6  }
  0x13   : > { %p8_p4 = scmp.ge.s32.totalorder %s11_s6, 4  }
  0x15   :  { %10 = sbr.rel (!%p8_p4) target bundleno = 1 (0x1), region = 54 }

</bundles_post_ra>
